<compile_context>
chip_gen: v5e
topology: v5e:2x2
jax: 0.10.0
libtpu: 0.0.40
codegen_flags: <defaults>
</compile_context>

<pallas_src>
import functools

import numpy as np
import jax
import jax.numpy as jnp
from jax.experimental import pallas as pl
from jax.experimental.pallas import tpu as pltpu


def _fused_deconv_bn_lrelu_kernel(xpad_ref, wf_ref, gamma_ref, beta_ref, o_ref,
                                  *, eps, alpha):
    # xpad_ref : (N, Lpad, Cin)   zero-upsampled + padded input, channels-last
    # wf_ref   : (K, Cin, tc)     tap-major, tap-flipped weight block
    # gamma/beta: (1, tc)
    # o_ref    : (N, Lout, tc)    channels-last output block
    n, l_out, tc = o_ref.shape
    ksz, c_in, _ = wf_ref.shape

    # --- transposed conv as K contiguous-slice GEMMs, accumulated in f32 ---
    acc = jnp.zeros((n * l_out, tc), jnp.float32)
    for j in range(ksz):  # static, fully unrolled (K is small)
        xs = xpad_ref[:, j:j + l_out, :].reshape(n * l_out, c_in)
        acc = acc + jnp.dot(xs, wf_ref[j], preferred_element_type=jnp.float32)

    # --- fused epilogue: train-mode BatchNorm1d (batch stats) + affine + LeakyReLU ---
    inv_cnt = 1.0 / float(n * l_out)
    mean = jnp.sum(acc, axis=0, keepdims=True) * inv_cnt            # (1, tc)
    centered = acc - mean
    var = jnp.sum(centered * centered, axis=0, keepdims=True) * inv_cnt  # biased var
    scale = gamma_ref[...] * jax.lax.rsqrt(var + eps)                # (1, tc)
    z = centered * scale + beta_ref[...]
    z = jnp.where(z >= 0, z, alpha * z)                              # LeakyReLU
    o_ref[...] = z.reshape(n, l_out, tc).astype(o_ref.dtype)


def deconv1d_combo(x, w, b, gamma, beta, *, stride, padding, eps=1e-5, alpha=0.2):
    """Forward of Deconv1DCombo. x: (N, Cin, Lin) -> (N, Cout, Lout)."""
    n, c_in, l_in = x.shape
    c_in_w, c_out, ksz = w.shape
    assert c_in_w == c_in
    l_out = (l_in - 1) * stride - 2 * padding + ksz

    # Conv bias is algebraically cancelled by BN's batch-mean subtraction -> dropped.
    # TODO(synk): BatchNorm running-stat updates (training bookkeeping) are not part of
    # the forward output and are omitted (forward uses batch statistics, like PyTorch
    # train mode); the bias would only matter for those running stats.
    del b

    # ---- channel-block tiling over Cout ----
    tc = min(c_out, 128)
    c_out_p = ((c_out + tc - 1) // tc) * tc
    grid = (c_out_p // tc,)

    # ---- gather-form reformulation: zero-upsample + pad x, channels-last ----
    # xpad[n, K-1-p + li*stride, ci] = x[n, ci, li], zeros elsewhere.
    l_full = (l_in - 1) * stride + 1 + 2 * (ksz - 1)
    l_pad = l_out + ksz - 1
    x_cl = jnp.transpose(x, (0, 2, 1)).astype(jnp.float32)          # (N, Lin, Cin)
    x_full = jnp.zeros((n, l_full, c_in), jnp.float32)
    x_full = x_full.at[:, ksz - 1: ksz - 1 + (l_in - 1) * stride + 1: stride, :].set(x_cl)
    xpad = x_full[:, padding: padding + l_pad, :]                   # (N, Lpad, Cin)

    # ---- tap-major, tap-flipped weight: wf[j, ci, co] = w[ci, co, K-1-j] ----
    wf = jnp.transpose(w[:, :, ::-1], (2, 0, 1)).astype(jnp.float32)  # (K, Cin, Cout)
    wf = jnp.pad(wf, ((0, 0), (0, 0), (0, c_out_p - c_out)))
    gamma_p = jnp.pad(gamma.astype(jnp.float32), (0, c_out_p - c_out)).reshape(1, c_out_p)
    beta_p = jnp.pad(beta.astype(jnp.float32), (0, c_out_p - c_out)).reshape(1, c_out_p)

    out_cl = pl.pallas_call(
        functools.partial(_fused_deconv_bn_lrelu_kernel, eps=eps, alpha=alpha),
        out_shape=jax.ShapeDtypeStruct((n, l_out, c_out_p), jnp.float32),
        grid=grid,
        in_specs=[
            pl.BlockSpec((n, l_pad, c_in), lambda i: (0, 0, 0)),    # xpad (shared)
            pl.BlockSpec((ksz, c_in, tc), lambda i: (0, 0, i)),     # weight block
            pl.BlockSpec((1, tc), lambda i: (0, i)),                # gamma block
            pl.BlockSpec((1, tc), lambda i: (0, i)),                # beta block
        ],
        out_specs=pl.BlockSpec((n, l_out, tc), lambda i: (0, 0, i)),
        compiler_params=pltpu.CompilerParams(
            dimension_semantics=("parallel",),
            vmem_limit_bytes=64 * 1024 * 1024,
        ),
    )(xpad, wf, gamma_p, beta_p)

    # Only remaining layout glue: drop channel padding and return to PyTorch NCL.
    return jnp.transpose(out_cl[:, :, :c_out], (0, 2, 1))


def _reference_numpy(x, w, b, gamma, beta, stride, padding, eps, alpha):
    x = np.asarray(x, np.float32)
    w = np.asarray(w, np.float32)
    b = np.asarray(b, np.float32)
    gamma = np.asarray(gamma, np.float32)
    beta = np.asarray(beta, np.float32)
    n, c_in, l_in = x.shape
    _, c_out, ksz = w.shape
    l_out = (l_in - 1) * stride - 2 * padding + ksz
    y = np.zeros((n, c_out, l_out), np.float32)
    for ni in range(n):
        for co in range(c_out):
            for ci in range(c_in):
                for li in range(l_in):
                    for kk in range(ksz):
                        lo = li * stride + kk - padding
                        if 0 <= lo < l_out:
                            y[ni, co, lo] += x[ni, ci, li] * w[ci, co, kk]
    y = y + b[None, :, None]
    mean = y.mean(axis=(0, 2), keepdims=True)
    var = y.var(axis=(0, 2), keepdims=True)  # biased, as in PyTorch train-mode BN
    yh = (y - mean) / np.sqrt(var + eps)
    z = yh * gamma[None, :, None] + beta[None, :, None]
    return np.where(z >= 0, z, alpha * z)


if __name__ == "__main__":
    # Small shapes consistent with the module: ConvTranspose1d(Cin=4, Cout=8, K=4, stride=2, pad=1)
    N, C_IN, L_IN = 2, 4, 8
    C_OUT, KSZ, STRIDE, PAD = 8, 4, 2, 1
    ALPHA, EPS = 0.2, 1e-5

    key = jax.random.PRNGKey(0)
    kx, kw, kb, kg, kbeta = jax.random.split(key, 5)

    x = jax.random.normal(kx, (N, C_IN, L_IN), dtype=jnp.float32)
    # ConvTranspose1d weight shape: (in_channels, out_channels, kernel_size)
    w = 0.1 * jax.random.normal(kw, (C_IN, C_OUT, KSZ), dtype=jnp.float32)
    b = 0.1 * jax.random.normal(kb, (C_OUT,), dtype=jnp.float32)
    # BatchNorm1d affine params (deterministically perturbed from the default 1/0)
    gamma = 1.0 + 0.1 * jax.random.normal(kg, (C_OUT,), dtype=jnp.float32)
    beta = 0.1 * jax.random.normal(kbeta, (C_OUT,), dtype=jnp.float32)

    out = deconv1d_combo(x, w, b, gamma, beta, stride=STRIDE, padding=PAD,
                         eps=EPS, alpha=ALPHA)
    out = jax.block_until_ready(out)

    ref = _reference_numpy(x, w, b, gamma, beta, STRIDE, PAD, EPS, ALPHA)
    np.testing.assert_allclose(np.asarray(out), ref, rtol=1e-3, atol=1e-3)

    print("KERNEL_OK")
</pallas_src>

<mosaic_0001>
module attributes {stable_mosaic.version = 11 : i64} {
  func.func @_fused_deconv_bn_lrelu_kernel(%arg0: i32, %arg1: memref<2x19x4xf32, #tpu.memory_space<vmem>>, %arg2: memref<4x4x8xf32, #tpu.memory_space<vmem>>, %arg3: memref<1x8xf32, #tpu.memory_space<vmem>>, %arg4: memref<1x8xf32, #tpu.memory_space<vmem>>, %arg5: memref<2x16x8xf32, #tpu.memory_space<vmem>>) attributes {dimension_semantics = [#tpu.dimension_semantics<parallel>], iteration_bounds = array<i64: 1>, scalar_prefetch = 0 : i64, scratch_operands = 0 : i64, tpu.core_type = #tpu.core_type<tc>, window_params = [{pipeline_mode = #tpu.pipeline_mode<synchronous>, transform_indices = @transform_0, window_bounds = array<i64: 2, 19, 4>}, {transform_indices = @transform_1, window_bounds = array<i64: 4, 4, 8>}, {transform_indices = @transform_2, window_bounds = array<i64: 1, 8>}, {transform_indices = @transform_3, window_bounds = array<i64: 1, 8>}, {transform_indices = @transform_4, window_bounds = array<i64: 2, 16, 8>}]} {
    %cst = arith.constant 0.000000e+00 : f32
    %0 = vector.broadcast %cst : f32 to vector<32x8xf32>
    %c0 = arith.constant 0 : index
    %c0_0 = arith.constant 0 : index
    %c0_1 = arith.constant 0 : index
    %1 = vector.load %arg1[%c0, %c0_0, %c0_1] : memref<2x19x4xf32, #tpu.memory_space<vmem>>, vector<2x16x4xf32>
    %2 = vector.shape_cast %1 : vector<2x16x4xf32> to vector<32x4xf32>
    %c0_2 = arith.constant 0 : index
    %c0_3 = arith.constant 0 : index
    %c0_4 = arith.constant 0 : index
    %3 = vector.load %arg2[%c0_2, %c0_3, %c0_4] : memref<4x4x8xf32, #tpu.memory_space<vmem>>, vector<1x4x8xf32>
    %4 = vector.shape_cast %3 : vector<1x4x8xf32> to vector<4x8xf32>
    %cst_5 = arith.constant dense<0.000000e+00> : vector<32x8xf32>
    %5 = tpu.matmul %2, %4, %cst_5 {dimension_numbers = #tpu.dot_dimension_numbers<[1], [0], [0], [1], [0, 0, 1, 1], [], []>} : vector<32x4xf32>, vector<4x8xf32>, vector<32x8xf32> -> vector<32x8xf32>
    %6 = arith.addf %0, %5 : vector<32x8xf32>
    %c0_6 = arith.constant 0 : index
    %c1 = arith.constant 1 : index
    %c0_7 = arith.constant 0 : index
    %7 = vector.load %arg1[%c0_6, %c1, %c0_7] : memref<2x19x4xf32, #tpu.memory_space<vmem>>, vector<2x16x4xf32>
    %8 = vector.shape_cast %7 : vector<2x16x4xf32> to vector<32x4xf32>
    %c1_8 = arith.constant 1 : index
    %c0_9 = arith.constant 0 : index
    %c0_10 = arith.constant 0 : index
    %9 = vector.load %arg2[%c1_8, %c0_9, %c0_10] : memref<4x4x8xf32, #tpu.memory_space<vmem>>, vector<1x4x8xf32>
    %10 = vector.shape_cast %9 : vector<1x4x8xf32> to vector<4x8xf32>
    %cst_11 = arith.constant dense<0.000000e+00> : vector<32x8xf32>
    %11 = tpu.matmul %8, %10, %cst_11 {dimension_numbers = #tpu.dot_dimension_numbers<[1], [0], [0], [1], [0, 0, 1, 1], [], []>} : vector<32x4xf32>, vector<4x8xf32>, vector<32x8xf32> -> vector<32x8xf32>
    %12 = arith.addf %6, %11 : vector<32x8xf32>
    %c0_12 = arith.constant 0 : index
    %c2 = arith.constant 2 : index
    %c0_13 = arith.constant 0 : index
    %13 = vector.load %arg1[%c0_12, %c2, %c0_13] : memref<2x19x4xf32, #tpu.memory_space<vmem>>, vector<2x16x4xf32>
    %14 = vector.shape_cast %13 : vector<2x16x4xf32> to vector<32x4xf32>
    %c2_14 = arith.constant 2 : index
    %c0_15 = arith.constant 0 : index
    %c0_16 = arith.constant 0 : index
    %15 = vector.load %arg2[%c2_14, %c0_15, %c0_16] : memref<4x4x8xf32, #tpu.memory_space<vmem>>, vector<1x4x8xf32>
    %16 = vector.shape_cast %15 : vector<1x4x8xf32> to vector<4x8xf32>
    %cst_17 = arith.constant dense<0.000000e+00> : vector<32x8xf32>
    %17 = tpu.matmul %14, %16, %cst_17 {dimension_numbers = #tpu.dot_dimension_numbers<[1], [0], [0], [1], [0, 0, 1, 1], [], []>} : vector<32x4xf32>, vector<4x8xf32>, vector<32x8xf32> -> vector<32x8xf32>
    %18 = arith.addf %12, %17 : vector<32x8xf32>
    %c0_18 = arith.constant 0 : index
    %c3 = arith.constant 3 : index
    %c0_19 = arith.constant 0 : index
    %19 = vector.load %arg1[%c0_18, %c3, %c0_19] : memref<2x19x4xf32, #tpu.memory_space<vmem>>, vector<2x16x4xf32>
    %20 = vector.shape_cast %19 : vector<2x16x4xf32> to vector<32x4xf32>
    %c3_20 = arith.constant 3 : index
    %c0_21 = arith.constant 0 : index
    %c0_22 = arith.constant 0 : index
    %21 = vector.load %arg2[%c3_20, %c0_21, %c0_22] : memref<4x4x8xf32, #tpu.memory_space<vmem>>, vector<1x4x8xf32>
    %22 = vector.shape_cast %21 : vector<1x4x8xf32> to vector<4x8xf32>
    %cst_23 = arith.constant dense<0.000000e+00> : vector<32x8xf32>
    %23 = tpu.matmul %20, %22, %cst_23 {dimension_numbers = #tpu.dot_dimension_numbers<[1], [0], [0], [1], [0, 0, 1, 1], [], []>} : vector<32x4xf32>, vector<4x8xf32>, vector<32x8xf32> -> vector<32x8xf32>
    %24 = arith.addf %18, %23 : vector<32x8xf32>
    %cst_24 = arith.constant dense<0.000000e+00> : vector<8xf32>
    %25 = vector.multi_reduction <add>, %24, %cst_24 [0] : vector<32x8xf32> to vector<8xf32>
    %26 = vector.shape_cast %25 : vector<8xf32> to vector<1x8xf32>
    %cst_25 = arith.constant 3.125000e-02 : f32
    %27 = vector.broadcast %cst_25 : f32 to vector<1x8xf32>
    %28 = arith.mulf %26, %27 : vector<1x8xf32>
    %29 = vector.broadcast %28 : vector<1x8xf32> to vector<32x8xf32>
    %30 = arith.subf %24, %29 : vector<32x8xf32>
    %31 = arith.mulf %30, %30 : vector<32x8xf32>
    %cst_26 = arith.constant dense<0.000000e+00> : vector<8xf32>
    %32 = vector.multi_reduction <add>, %31, %cst_26 [0] : vector<32x8xf32> to vector<8xf32>
    %33 = vector.shape_cast %32 : vector<8xf32> to vector<1x8xf32>
    %cst_27 = arith.constant 3.125000e-02 : f32
    %34 = vector.broadcast %cst_27 : f32 to vector<1x8xf32>
    %35 = arith.mulf %33, %34 : vector<1x8xf32>
    %c0_28 = arith.constant 0 : index
    %c0_29 = arith.constant 0 : index
    %36 = vector.load %arg3[%c0_28, %c0_29] : memref<1x8xf32, #tpu.memory_space<vmem>>, vector<1x8xf32>
    %cst_30 = arith.constant 9.99999974E-6 : f32
    %37 = vector.broadcast %cst_30 : f32 to vector<1x8xf32>
    %38 = arith.addf %35, %37 : vector<1x8xf32>
    %39 = math.rsqrt %38 : vector<1x8xf32>
    %40 = arith.mulf %36, %39 : vector<1x8xf32>
    %41 = vector.broadcast %40 : vector<1x8xf32> to vector<32x8xf32>
    %42 = arith.mulf %30, %41 : vector<32x8xf32>
    %c0_31 = arith.constant 0 : index
    %c0_32 = arith.constant 0 : index
    %43 = vector.load %arg4[%c0_31, %c0_32] : memref<1x8xf32, #tpu.memory_space<vmem>>, vector<1x8xf32>
    %44 = vector.broadcast %43 : vector<1x8xf32> to vector<32x8xf32>
    %45 = arith.addf %42, %44 : vector<32x8xf32>
    %cst_33 = arith.constant 0.000000e+00 : f32
    %46 = vector.broadcast %cst_33 : f32 to vector<32x8xf32>
    %47 = arith.cmpf oge, %45, %46 : vector<32x8xf32>
    %cst_34 = arith.constant 2.000000e-01 : f32
    %48 = vector.broadcast %cst_34 : f32 to vector<32x8xf32>
    %49 = arith.mulf %48, %45 : vector<32x8xf32>
    %50 = arith.select %47, %45, %49 : vector<32x8xi1>, vector<32x8xf32>
    %51 = vector.shape_cast %50 : vector<32x8xf32> to vector<2x16x8xf32>
    %c0_35 = arith.constant 0 : index
    %c0_36 = arith.constant 0 : index
    %c0_37 = arith.constant 0 : index
    %52 = vector.load %arg5[%c0_35, %c0_36, %c0_37] : memref<2x16x8xf32, #tpu.memory_space<vmem>>, vector<2x16x8xf32>
    tpu.vector_store %arg5[%c0_35, %c0_36, %c0_37], %51 {strides = array<i32>} : memref<2x16x8xf32, #tpu.memory_space<vmem>>, vector<2x16x8xf32>,
    return
  }
  func.func @transform_0(%arg0: i32) -> (i32, i32, i32) {
    %c0_i32 = arith.constant 0 : i32
    %c0_i32_0 = arith.constant 0 : i32
    %c0_i32_1 = arith.constant 0 : i32
    %c0_i32_2 = arith.constant 0 : i32
    return %c0_i32, %c0_i32_0, %c0_i32_1 : i32, i32, i32
  }
  func.func @transform_1(%arg0: i32) -> (i32, i32, i32) {
    %c0_i32 = arith.constant 0 : i32
    %c0_i32_0 = arith.constant 0 : i32
    %c0_i32_1 = arith.constant 0 : i32
    return %c0_i32, %c0_i32_0, %arg0 : i32, i32, i32
  }
  func.func @transform_2(%arg0: i32) -> (i32, i32) {
    %c0_i32 = arith.constant 0 : i32
    %c0_i32_0 = arith.constant 0 : i32
    return %c0_i32, %arg0 : i32, i32
  }
  func.func @transform_3(%arg0: i32) -> (i32, i32) {
    %c0_i32 = arith.constant 0 : i32
    %c0_i32_0 = arith.constant 0 : i32
    return %c0_i32, %arg0 : i32, i32
  }
  func.func @transform_4(%arg0: i32) -> (i32, i32, i32) {
    %c0_i32 = arith.constant 0 : i32
    %c0_i32_0 = arith.constant 0 : i32
    %c0_i32_1 = arith.constant 0 : i32
    return %c0_i32, %c0_i32_0, %arg0 : i32, i32, i32
  }
}

</mosaic_0001>

<bundles_post_ra>
// kernel: tpu_custom_call.1
= control target key start
LH: loop header
LB: loop body
LE: loop exit
PB: predicated region body
PF: predicated region fallthrough
CT: control target
= control target key end

     0   :  { %vm41_vm0 = vcmask 1043456   ;;  %vm28_vm1 = vcmask 31744   ;;  %vm226_vm2 = vcmask 64512   ;;  %s472_s1 = inlined_call_operand.vmem [shape: f32[4,4,8], index: 1, kind: input, shape index: {}]   ;;  %s473_s0 = inlined_call_operand.vmem [shape: f32[2,19,4], index: 0, kind: input, shape index: {}]   ;;  %s474_s3 = inlined_call_operand.vmem [shape: f32[1,8], index: 3, kind: input, shape index: {}]   ;;  %s475_s2 = inlined_call_operand.vmem [shape: f32[1,8], index: 2, kind: input, shape index: {}]   ;;  %s476_s4 = inlined_call_operand.vmem [shape: f32[2,16,8], index: 4, kind: output, shape index: {}]  }
   0x1   :  { %v322_v0 = vld [vmem:[%s472_s1 + $0x8] sm:$0xf]  ;;  %v328_v2 = vld [vmem:[%s472_s1 + $0xc] sm:$0xf]  ;;  %v311_v4 = vld [vmem:[%s472_s1 + $0x4] sm:$0xf] }
   0x2   :  { %v118_v1 = vld [vmem:[%s473_s0 + $0x2] sm:$0xff]  ;;  %323 = vmatpush.msk.msra.mxu2 %vm41_vm0, %v322_v0  ;;  %329 = vmatpush.msk.msra.mxu3 %vm41_vm0, %v328_v2  ;;  %v119_v8 = vld [vmem:[%s473_s0 + $0xa] sm:$0xff]  ;;  %v120_v12 = vld [vmem:[%s473_s0 + $0x1a] sm:$0xff] }
   0x3   :  { %v172_v3 = vld [vmem:[%s473_s0 + $0x3] sm:$0xff]  ;;  %324 = vmatmul.msk.f32.vlgmr.msra.gmra.mxu2 %vm28_vm1, %v118_v1  ;;  %312 = vmatpush.msk.msra.mxu0 %vm41_vm0, %v311_v4  ;;  %v173_v9 = vld [vmem:[%s473_s0 + $0xb] sm:$0xff]  ;;  %v174_v13 = vld [vmem:[%s473_s0 + $0x1b] sm:$0xff] }
   0x4   :  { %v21_v5 = vld [vmem:[%s472_s1] sm:$0xf]  ;;  %330 = vmatmul.msk.f32.vlgmr.msra.gmra.mxu3 %vm28_vm1, %v172_v3  ;;  %v23_v10 = vld [vmem:[%s473_s0 + $0x9] sm:$0xff]  ;;  %v19_v15 = vld [vmem:[%s473_s0 + $0x18] sm:$0xff] }
   0x5   :  { %v22_v6 = vld [vmem:[%s473_s0 + $0x1] sm:$0xff]  ;;  %317 = vmatpush.msk.msra.mxu1 %vm41_vm0, %v21_v5  ;;  %v24_v14 = vld [vmem:[%s473_s0 + $0x19] sm:$0xff] }
   0x6   :  { %v17_v7 = vld [vmem:[%s473_s0] sm:$0xff]  ;;  %313 = vmatmul.msk.f32.vlgmr.msra.gmra.mxu0 %vm28_vm1, %v22_v6  ;;  %v18_v11 = vld [vmem:[%s473_s0 + $0x8] sm:$0xff] }
   0x7   :  { %318 = vmatmul.msk.f32.vlgmr.msra.gmra.mxu1 %vm28_vm1, %v17_v7  ;;  %v121_v16 = vld [vmem:[%s473_s0 + $0x22] sm:$0xff] }
   0x8   :  { %v175_v17 = vld [vmem:[%s473_s0 + $0x23] sm:$0xff] }
   0x9   :  { %v25_v18 = vld [vmem:[%s473_s0 + $0x21] sm:$0xff] }
   0xa   :  { %v20_v19 = vld [vmem:[%s473_s0 + $0x20] sm:$0xff] }
   0xb   :  { %325 = vmatmul.msk.f32.gmra.mxu2 %vm28_vm1, %v119_v8 }
   0xc   :  { %331 = vmatmul.msk.f32.gmra.mxu3 %vm28_vm1, %v173_v9 }
   0xe   :  { %314 = vmatmul.msk.f32.gmra.mxu0 %vm28_vm1, %v23_v10 }
   0xf   :  { %319 = vmatmul.msk.f32.gmra.mxu1 %vm28_vm1, %v18_v11 }
  0x13   :  { %326 = vmatmul.msk.f32.gmra.mxu2 %vm28_vm1, %v120_v12 }
  0x14   :  { %332 = vmatmul.msk.f32.gmra.mxu3 %vm28_vm1, %v174_v13 }
  0x16   :  { %315 = vmatmul.msk.f32.gmra.mxu0 %vm28_vm1, %v24_v14 }
  0x17   :  { %320 = vmatmul.msk.f32.gmra.mxu1 %vm28_vm1, %v19_v15 }
  0x1b   :  { %327 = vmatmul.msk.f32.gmra.mxu2 %vm28_vm1, %v121_v16 }
  0x1c   :  { %333 = vmatmul.msk.f32.gmra.mxu3 %vm28_vm1, %v175_v17 }
  0x1e   :  { %316 = vmatmul.msk.f32.gmra.mxu0 %vm28_vm1, %v25_v18 }
  0x1f   :  { %321 = vmatmul.msk.f32.gmra.mxu1 %vm28_vm1, %v20_v19 }
  0x83   :  { %v62_v20 = vpop.f32.mrf.mxu0 }
  0x84   :  { %v106_v21 = vpop.f32.mrf.mxu1 }
  0x85   :  { %v107_v31 = vadd.f32 %v106_v21, %v62_v20 }
  0x86   :  { %v156_v22 = vpop.f32.mrf.mxu2 }
  0x87   :  { %v210_v23 = vpop.f32.mrf.mxu3  ;;  %v168_v36 = vadd.f32 %v156_v22, %v107_v31  ;;  %v334_v31 = vld [vmem:[%s474_s3] ss:$0 sm:$0xff] }
  0x89   :  { %v222_v41 = vadd.f32 %v210_v23, %v168_v36 }
  0x8b   :  { %v65_v24 = vpop.f32.mrf.mxu0  ;;  %v227_v47 = vsel %vm226_vm2, %v222_v41, 0.0 }
  0x8c   :  { %v109_v25 = vpop.f32.mrf.mxu1 }
  0x8d   :  { %v110_v28 = vadd.f32 %v109_v25, %v65_v24 }
  0x8e   :  { %v159_v26 = vpop.f32.mrf.mxu2 }
  0x8f   :  { %v213_v27 = vpop.f32.mrf.mxu3  ;;  %v169_v33 = vadd.f32 %v159_v26, %v110_v28  ;;  %v263_v26 = vld [vmem:[%s475_s2] sm:$0x1] }
  0x91   :  { %v223_v38 = vadd.f32 %v213_v27, %v169_v33 }
  0x93   :  { %v68_v29 = vpop.f32.mrf.mxu0  ;;  %v228_v44 = vsel %vm226_vm2, %v223_v38, 0.0 }
  0x94   :  { %v112_v30 = vpop.f32.mrf.mxu1  ;;  %v229_v50 = vadd.f32 %v228_v44, %v227_v47 }
  0x95   :  { %v113_v32 = vadd.f32 %v112_v30, %v68_v29 }
  0x96   :  { %v162_v34 = vpop.f32.mrf.mxu2 }
  0x97   :  { %v216_v35 = vpop.f32.mrf.mxu3  ;;  %v170_v37 = vadd.f32 %v162_v34, %v113_v32 }
  0x99   :  { %v224_v42 = vadd.f32 %v216_v35, %v170_v37 }
  0x9b   :  { %v71_v39 = vpop.f32.mrf.mxu0  ;;  %v230_v48 = vsel %vm226_vm2, %v224_v42, 0.0 }
  0x9c   :  { %v115_v40 = vpop.f32.mrf.mxu1  ;;  %v231_v52 = vadd.f32 %v230_v48, %v229_v50 }
  0x9d   :  { %v116_v43 = vadd.f32 %v115_v40, %v71_v39 }
  0x9e   :  { %v165_v45 = vpop.f32.mrf.mxu2 }
  0x9f   :  { %v219_v46 = vpop.f32.mrf.mxu3  ;;  %v171_v49 = vadd.f32 %v165_v45, %v116_v43 }
  0xa1   :  { %v225_v51 = vadd.f32 %v219_v46, %v171_v49 }
  0xa3   :  { %v232_v53 = vsel %vm226_vm2, %v225_v51, 0.0 }
  0xa4   :  { %v233_v54 = vadd.f32 %v232_v53, %v231_v52 }
  0xa6   :  { %v234_v55 = vrot.slane %v233_v54, 4 }
  0xa8   :  { %v235_v56 = vadd.f32 %v234_v55, %v233_v54 }
  0xaa   :  { %v236_v57 = vrot.slane %v235_v56, 2 }
  0xac   :  { %v237_v58 = vadd.f32 %v236_v57, %v235_v56 }
  0xae   :  { %v238_v59 = vrot.slane %v237_v58, 1 }
  0xb0   :  { %v239_v60 = vadd.f32 %v238_v59, %v237_v58 }
  0xb2   :  { %v240_v61 = vmul.f32 0.03125, %v239_v60 }
  0xb4   :  { %v241_v62 = vsub.f32 %v222_v41, %v240_v61  ;;  %v242_v63 = vsub.f32 %v223_v38, %v240_v61  ;;  %v243_v0 = vsub.f32 %v224_v42, %v240_v61  ;;  %v244_v1 = vsub.f32 %v225_v51, %v240_v61 }
  0xb6   :  { %v245_v2 = vmul.f32 %v241_v62, %v241_v62  ;;  %v246_v3 = vmul.f32 %v242_v63, %v242_v63  ;;  %v247_v4 = vmul.f32 %v243_v0, %v243_v0  ;;  %v248_v5 = vmul.f32 %v244_v1, %v244_v1 }
  0xb8   :  { %v249_v6 = vsel %vm226_vm2, %v245_v2, 0.0  ;;  %v250_v7 = vsel %vm226_vm2, %v246_v3, 0.0  ;;  %v252_v9 = vsel %vm226_vm2, %v247_v4, 0.0  ;;  %v254_v11 = vsel %vm226_vm2, %v248_v5, 0.0 }
  0xb9   :  { %v251_v8 = vadd.f32 %v250_v7, %v249_v6 }
  0xbb   :  { %v253_v10 = vadd.f32 %v252_v9, %v251_v8 }
  0xbd   :  { %v255_v12 = vadd.f32 %v254_v11, %v253_v10 }
  0xbf   :  { %v256_v13 = vrot.slane %v255_v12, 4 }
  0xc1   :  { %v257_v14 = vadd.f32 %v256_v13, %v255_v12 }
  0xc3   :  { %v258_v15 = vrot.slane %v257_v14, 2 }
  0xc5   :  { %v259_v16 = vadd.f32 %v258_v15, %v257_v14 }
  0xc7   :  { %v260_v17 = vrot.slane %v259_v16, 1 }
  0xc9   :  { %v261_v18 = vadd.f32 %v260_v17, %v259_v16 }
  0xcb   :  { %v262_v19 = vmul.f32 0.03125, %v261_v18 }
  0xcd   :  { %v264_v20 = vadd.f32 1e-05, %v262_v19 }
  0xcf   :  { %335 = vrsqrt.f32 %v264_v20  ;;  %vm271_vm4 = vweird.f32 %v264_v20 }
  0xd5   :  { %v336_v21 = vpop.eup %335 }
  0xd6   :  { %v266_v22 = vmul.f32 %v336_v21, %v264_v20  ;;  %vm272_vm3 = vweird.f32 %v336_v21 }
  0xd7   :  { %vm273_vm5 = vmor %vm271_vm4, %vm272_vm3 }
  0xd8   :  { %v267_v23 = vmul.f32 %v336_v21, %v266_v22 }
  0xda   :  { %v268_v24 = vmul.f32 0.5, %v267_v23 }
  0xdc   :  { %v269_v25 = vsub.f32 1.5, %v268_v24 }
  0xde   :  { %v270_v27 = vmul.f32 %v336_v21, %v269_v25 }
  0xe0   :  { %v274_v28 = vsel %vm273_vm5, %v336_v21, %v270_v27 }
  0xe1   :  { %v275_v29 = vmul.f32 %v274_v28, %v263_v26 }
  0xe3   :  { %v277_v30 = vperm.slane %v275_v29, 0 }
  0xe5   :  { %v279_v32 = vmul.f32 %v277_v30, %v241_v62  ;;  %v280_v33 = vmul.f32 %v277_v30, %v242_v63  ;;  %v281_v34 = vmul.f32 %v277_v30, %v243_v0  ;;  %v282_v35 = vmul.f32 %v277_v30, %v244_v1 }
  0xe7   :  { %v287_v36 = vadd.f32 %v334_v31, %v279_v32  ;;  %v288_v37 = vadd.f32 %v334_v31, %v280_v33  ;;  %v289_v38 = vadd.f32 %v334_v31, %v281_v34  ;;  %v290_v39 = vadd.f32 %v334_v31, %v282_v35 }
  0xe9   :  { %vm291_vm6 = vcmp.ge.f32.partialorder %v287_v36, 0.0  ;;  %vm292_vm7 = vcmp.ge.f32.partialorder %v288_v37, 0.0  ;;  %vm293_vm8 = vcmp.ge.f32.partialorder %v289_v38, 0.0  ;;  %vm294_vm9 = vcmp.ge.f32.partialorder %v290_v39, 0.0 }
  0xea   :  { %v295_v40 = vmul.f32 0.2, %v287_v36  ;;  %v296_v41 = vmul.f32 0.2, %v288_v37  ;;  %v297_v42 = vmul.f32 0.2, %v289_v38 }
  0xeb   :  { %v298_v43 = vmul.f32 0.2, %v290_v39 }
  0xec   :  { %v299_v44 = vsel %vm291_vm6, %v287_v36, %v295_v40  ;;  %v300_v45 = vsel %vm292_vm7, %v288_v37, %v296_v41  ;;  %v301_v46 = vsel %vm293_vm8, %v289_v38, %v297_v42 }
  0xed   :  { %v302_v47 = vsel %vm294_vm9, %v290_v39, %v298_v43  ;;  %303 = vst.msk [vmem:[%s476_s4] sm:$0xff] %vm226_vm2, %v299_v44 }
  0xee   :  { %304 = vst.msk [vmem:[%s476_s4 + $0x8] sm:$0xff] %vm226_vm2, %v300_v45 }
  0xef   :  { %305 = vst.msk [vmem:[%s476_s4 + $0x10] sm:$0xff] %vm226_vm2, %v301_v46 }
  0xf0   :  { %306 = vst.msk [vmem:[%s476_s4 + $0x18] sm:$0xff] %vm226_vm2, %v302_v47 }

</bundles_post_ra>
